<compile_context>
chip_gen: v6e
topology: v6e:2x2x1
jax: 0.10.0
libtpu: 0.0.40
codegen_flags: <defaults>
</compile_context>

<pallas_src>
import functools

import jax
import jax.numpy as jnp
from jax.experimental import pallas as pl
from jax.experimental.pallas import tpu as pltpu


def _round_up(x, m):
    return (x + m - 1) // m * m


# ----------------------------- Pallas kernel ------------------------------ #
def _patch_embed_proj_kernel(x_ref, w_ref, b_ref, o_ref, acc_ref):
    """Computes one (tm, tn) output tile; K is the last (reduction) grid axis."""
    k = pl.program_id(2)

    @pl.when(k == 0)
    def _init():
        acc_ref[...] = jnp.zeros_like(acc_ref)

    # bf16 x bf16 -> f32 accumulation on the MXU.
    acc_ref[...] += jnp.dot(x_ref[...], w_ref[...],
                            preferred_element_type=jnp.float32)

    @pl.when(k == pl.num_programs(2) - 1)
    def _finalize():
        # Bias added once, in f32 (v5e has no bf16 VPU path), cast last.
        o_ref[...] = (acc_ref[...] + b_ref[...]).astype(o_ref.dtype)


def patch_embed_projection(x2d, weight, bias, *, tm=256, tn=256, tk=512):
    """x2d: (M, K) f32, weight: (N, K) f32 (torch Linear layout), bias: (N,).

    Returns (M, N) f32 = x2d @ weight.T + bias as a tiled Pallas matmul with
    bf16 inputs and f32 accumulation.
    """
    M, K = x2d.shape
    N = weight.shape[0]

    # Tile sizes: lane dims (tk of LHS, tn of RHS/out) multiples of 128,
    # sublane dims multiples of 16 (bf16 packing); never larger than needed.
    tm = min(tm, _round_up(M, 16))
    tn = min(tn, _round_up(N, 128))
    tk = min(tk, _round_up(K, 128))

    Mp = _round_up(M, tm)
    Np = _round_up(N, tn)
    Kp = _round_up(K, tk)

    # bf16 at the pallas_call boundary; zero padding keeps the K-reduction
    # exact (padded rows/cols contribute 0), so no in-kernel masking needed.
    # For real ViT shapes (K, N already 128-multiples) the pads are no-ops.
    x_p = jnp.pad(x2d.astype(jnp.bfloat16), ((0, Mp - M), (0, Kp - K)))
    w_p = jnp.pad(weight.T.astype(jnp.bfloat16), ((0, Kp - K), (0, Np - N)))
    b_p = jnp.pad(bias.astype(jnp.float32).reshape(1, N),
                  ((0, 0), (0, Np - N)))

    grid = (Mp // tm, Np // tn, Kp // tk)

    # Explicit VMEM budget: double-buffered inputs/outputs + f32 accumulator.
    # Stays well inside the 32 MiB scoped VMEM that is safe on v5e/v6e/v7x.
    tile_bytes = (2 * (tm * tk * 2)        # x tiles (bf16, 2 buffers)
                  + 2 * (tk * tn * 2)      # w tiles (bf16, 2 buffers)
                  + 2 * (tn * 4)           # bias tiles (f32, 2 buffers)
                  + 2 * (tm * tn * 4)      # out tiles (f32, 2 buffers)
                  + (tm * tn * 4))         # f32 accumulator scratch
    vmem_limit = int(min(max(2 * tile_bytes, 16 * 1024 * 1024),
                         32 * 1024 * 1024))

    cost = pl.CostEstimate(
        flops=2 * Mp * Np * Kp,
        transcendentals=0,
        bytes_accessed=(x_p.size * 2 + w_p.size * 2 + b_p.size * 4
                        + Mp * Np * 4),
    )

    out_p = pl.pallas_call(
        _patch_embed_proj_kernel,
        out_shape=jax.ShapeDtypeStruct((Mp, Np), jnp.float32),
        grid_spec=pltpu.PrefetchScalarGridSpec(
            num_scalar_prefetch=0,
            grid=grid,
            in_specs=[
                pl.BlockSpec((tm, tk), lambda i, j, k: (i, k)),
                pl.BlockSpec((tk, tn), lambda i, j, k: (k, j)),
                pl.BlockSpec((1, tn), lambda i, j, k: (0, j)),
            ],
            out_specs=pl.BlockSpec((tm, tn), lambda i, j, k: (i, j)),
            scratch_shapes=[pltpu.VMEM((tm, tn), jnp.float32)],
        ),
        compiler_params=pltpu.CompilerParams(
            dimension_semantics=("parallel", "parallel", "arbitrary"),
            vmem_limit_bytes=vmem_limit,
        ),
        cost_estimate=cost,
    )(x_p, w_p, b_p)

    return out_p[:M, :N]


# ------------------------------- JAX glue --------------------------------- #
def extract_patches(x, patch_size):
    """(B, C, H, W) -> (B, num_patches, C*p*p) matching torch unfold ordering."""
    B, C, H, W = x.shape
    p = patch_size
    x = x.reshape(B, C, H // p, p, W // p, p)          # (B, C, hb, ph, wb, pw)
    x = x.transpose(0, 2, 4, 1, 3, 5)                  # (B, hb, wb, C, ph, pw)
    return x.reshape(B, (H // p) * (W // p), C * p * p)


def init_patch_embedding_params(key, in_channels, patch_size, embed_dim):
    """Deterministic init mirroring nn.Linear(in_features, embed_dim) shapes."""
    in_features = in_channels * patch_size * patch_size
    k_w, k_b = jax.random.split(key)
    bound = 1.0 / (in_features ** 0.5)
    weight = jax.random.uniform(
        k_w, (embed_dim, in_features), jnp.float32, -bound, bound)
    bias = jax.random.uniform(k_b, (embed_dim,), jnp.float32, -bound, bound)
    return weight, bias


@functools.partial(jax.jit, static_argnames=("patch_size",))
def patch_embedding_forward(x, weight, bias, patch_size):
    """Full forward: (B, C, H, W) -> (B, num_patches, embed_dim)."""
    B = x.shape[0]
    patches = extract_patches(x, patch_size)           # (B, P, K)
    P, K = patches.shape[1], patches.shape[2]
    x2d = patches.reshape(B * P, K)
    y2d = patch_embed_projection(x2d, weight, bias)    # (B*P, embed_dim)
    return y2d.reshape(B, P, weight.shape[0])


# --------------------------------- main ----------------------------------- #
if __name__ == "__main__":
    # Small shapes consistent with the module: img_size=16, patch_size=4,
    # in_channels=4, embed_dim=32  ->  num_patches = (16 // 4) ** 2 = 16.
    B, C, H, W = 2, 4, 16, 16
    patch_size = 4
    embed_dim = 32

    key = jax.random.PRNGKey(0)
    k_x, k_params = jax.random.split(key)
    x = jax.random.normal(k_x, (B, C, H, W), dtype=jnp.float32)
    weight, bias = init_patch_embedding_params(k_params, C, patch_size, embed_dim)

    out = patch_embedding_forward(x, weight, bias, patch_size)
    out = jax.block_until_ready(out)

    # sanity check vs plain-JAX f32 reference (bf16 MXU inputs -> relaxed tol)
    ref = extract_patches(x, patch_size) @ weight.T + bias
    assert out.shape == (B, (H // patch_size) * (W // patch_size), embed_dim)
    assert jnp.allclose(out, ref, atol=5e-2, rtol=5e-2)

    print("KERNEL_OK")
</pallas_src>

<mosaic_0001>
module attributes {stable_mosaic.version = 11 : i64} {
  func.func @_patch_embed_proj_kernel(%arg0: i32, %arg1: i32, %arg2: i32, %arg3: memref<32x128xbf16, #tpu.memory_space<vmem>>, %arg4: memref<128x128xbf16, #tpu.memory_space<vmem>>, %arg5: memref<1x128xf32, #tpu.memory_space<vmem>>, %arg6: memref<32x128xf32, #tpu.memory_space<vmem>>, %arg7: memref<32x128xf32, #tpu.memory_space<vmem>>) attributes {dimension_semantics = [#tpu.dimension_semantics<parallel>, #tpu.dimension_semantics<parallel>, #tpu.dimension_semantics<arbitrary>], iteration_bounds = array<i64: 1, 1, 1>, scalar_prefetch = 0 : i64, scratch_operands = 1 : i64, tpu.core_type = #tpu.core_type<tc>, window_params = [{transform_indices = @transform_0, window_bounds = array<i64: 32, 128>}, {transform_indices = @transform_1, window_bounds = array<i64: 128, 128>}, {transform_indices = @transform_2, window_bounds = array<i64: 1, 128>}, {transform_indices = @transform_3, window_bounds = array<i64: 32, 128>}]} {
    %c0_i32 = arith.constant 0 : i32
    %0 = arith.cmpi eq, %arg2, %c0_i32 : i32
    %1 = arith.extui %0 : i1 to i32
    %c0_i32_0 = arith.constant 0 : i32
    %2 = arith.cmpi ne, %1, %c0_i32_0 : i32
    scf.if %2 {
      %cst_10 = arith.constant 0.000000e+00 : f32
      %12 = vector.broadcast %cst_10 : f32 to vector<32x128xf32>
      %c0_11 = arith.constant 0 : index
      %c0_12 = arith.constant 0 : index
      %13 = vector.load %arg7[%c0_11, %c0_12] : memref<32x128xf32, #tpu.memory_space<vmem>>, vector<32x128xf32>
      tpu.vector_store %arg7[%c0_11, %c0_12], %12 {strides = array<i32>} : memref<32x128xf32, #tpu.memory_space<vmem>>, vector<32x128xf32>,
    } else {
    }
    %c0 = arith.constant 0 : index
    %c0_1 = arith.constant 0 : index
    %3 = vector.load %arg7[%c0, %c0_1] : memref<32x128xf32, #tpu.memory_space<vmem>>, vector<32x128xf32>
    %c0_2 = arith.constant 0 : index
    %c0_3 = arith.constant 0 : index
    %4 = vector.load %arg3[%c0_2, %c0_3] : memref<32x128xbf16, #tpu.memory_space<vmem>>, vector<32x128xbf16>
    %c0_4 = arith.constant 0 : index
    %c0_5 = arith.constant 0 : index
    %5 = vector.load %arg4[%c0_4, %c0_5] : memref<128x128xbf16, #tpu.memory_space<vmem>>, vector<128x128xbf16>
    %cst = arith.constant dense<0.000000e+00> : vector<32x128xf32>
    %6 = tpu.matmul %4, %5, %cst {dimension_numbers = #tpu.dot_dimension_numbers<[1], [0], [0], [1], [0, 0, 1, 1], [], []>} : vector<32x128xbf16>, vector<128x128xbf16>, vector<32x128xf32> -> vector<32x128xf32>
    %7 = arith.addf %3, %6 : vector<32x128xf32>
    %c0_6 = arith.constant 0 : index
    %c0_7 = arith.constant 0 : index
    %8 = vector.load %arg7[%c0_6, %c0_7] : memref<32x128xf32, #tpu.memory_space<vmem>>, vector<32x128xf32>
    tpu.vector_store %arg7[%c0_6, %c0_7], %7 {strides = array<i32>} : memref<32x128xf32, #tpu.memory_space<vmem>>, vector<32x128xf32>,
    %c0_i32_8 = arith.constant 0 : i32
    %9 = arith.cmpi eq, %arg2, %c0_i32_8 : i32
    %10 = arith.extui %9 : i1 to i32
    %c0_i32_9 = arith.constant 0 : i32
    %11 = arith.cmpi ne, %10, %c0_i32_9 : i32
    scf.if %11 {
      %c0_10 = arith.constant 0 : index
      %c0_11 = arith.constant 0 : index
      %12 = vector.load %arg7[%c0_10, %c0_11] : memref<32x128xf32, #tpu.memory_space<vmem>>, vector<32x128xf32>
      %c0_12 = arith.constant 0 : index
      %c0_13 = arith.constant 0 : index
      %13 = vector.load %arg5[%c0_12, %c0_13] : memref<1x128xf32, #tpu.memory_space<vmem>>, vector<1x128xf32>
      %14 = vector.broadcast %13 : vector<1x128xf32> to vector<32x128xf32>
      %15 = arith.addf %12, %14 : vector<32x128xf32>
      %c0_14 = arith.constant 0 : index
      %c0_15 = arith.constant 0 : index
      %16 = vector.load %arg6[%c0_14, %c0_15] : memref<32x128xf32, #tpu.memory_space<vmem>>, vector<32x128xf32>
      tpu.vector_store %arg6[%c0_14, %c0_15], %15 {strides = array<i32>} : memref<32x128xf32, #tpu.memory_space<vmem>>, vector<32x128xf32>,
    } else {
    }
    return
  }
  func.func @transform_0(%arg0: i32, %arg1: i32, %arg2: i32) -> (i32, i32) {
    %c0_i32 = arith.constant 0 : i32
    return %arg0, %arg2 : i32, i32
  }
  func.func @transform_1(%arg0: i32, %arg1: i32, %arg2: i32) -> (i32, i32) {
    %c0_i32 = arith.constant 0 : i32
    return %arg2, %arg1 : i32, i32
  }
  func.func @transform_2(%arg0: i32, %arg1: i32, %arg2: i32) -> (i32, i32) {
    %c0_i32 = arith.constant 0 : i32
    %c0_i32_0 = arith.constant 0 : i32
    return %c0_i32, %arg1 : i32, i32
  }
  func.func @transform_3(%arg0: i32, %arg1: i32, %arg2: i32) -> (i32, i32) {
    %c0_i32 = arith.constant 0 : i32
    return %arg0, %arg1 : i32, i32
  }
}

</mosaic_0001>

<bundles_post_ra>
// kernel: patch_embedding_forward.1
= control target key start
LH: loop header
LB: loop body
LE: loop exit
PB: predicated region body
PF: predicated region fallthrough
CT: control target
= control target key end

     0   :  { %s338_s0 = inlined_call_operand.vmem [shape: bf16[32,128], index: 0, kind: input, shape index: {}]   ;;  %s339_s1 = inlined_call_operand.vmem [shape: bf16[128,128], index: 1, kind: input, shape index: {}]   ;;  %s340_s2 = inlined_call_operand.vmem [shape: f32[1,128], index: 2, kind: input, shape index: {}]   ;;  %s341_s3 = inlined_call_operand.hbm [shape: f32[32,128], index: 3, kind: output, shape index: {}]  }
   0x1   :  { %v247_v0 = vld [vmem:[%s339_s1 + $0x38] sm:$0xff]   ;;  %v248_v1 = vld [vmem:[%s339_s1 + $0x30] sm:$0xff]   ;;  %v249_v2 = vld [vmem:[%s339_s1 + $0x28] sm:$0xff]  }
   0x2   :  { %224 = vmatprep.subr.bf16.mxu0 %v247_v0  ;;  %v250_v3 = vld [vmem:[%s339_s1 + $0x20] sm:$0xff]  }
   0x3   :  { %225 = vmatpush3.bf16.msra.mxu0 %v247_v0  ;;  %v255_v4 = vld [vmem:[%s338_s0] sm:$0xff]  }
   0x4   :  { %226 = vmatprep.subr.bf16.mxu0 %v248_v1  ;;  %240 = vmatprep.mubr.bf16.mxu0 %v255_v4 }
   0x7   :  { %227 = vmatpush3.bf16.msra.mxu0 %v248_v1 }
   0x8   :  { %228 = vmatprep.subr.bf16.mxu0 %v249_v2 }
   0x9   :  { %8 = vsyncpa [#allocation4], 0  ;;  %v251_v5 = vld [vmem:[%s339_s1 + $0x18] sm:$0xff]   ;;  %v252_v6 = vld [vmem:[%s339_s1 + $0x10] sm:$0xff]   ;;  %s279_s7 = smov [#allocation3]  }
   0xa   :  { %v253_v7 = vld [vmem:[%s339_s1 + $0x8] sm:$0xff]   ;;  %v254_v8 = vld [vmem:[%s339_s1] sm:$0xff]   ;;  %s192_s8 = sshll.u32 %s279_s7, 4  ;;  %s193_s8 = int_to_ptr.vmem [resolvable:$true] %s192_s8 }
   0xb   :  { %229 = vmatpush3.bf16.msra.mxu0 %v249_v2  ;;  %v256_v9 = vld [vmem:[%s338_s0 + $0x8] sm:$0xff]   ;;  %v213_v10 = vld [vmem:[%s340_s2] ss:$0 sm:$0xff]  ;;  %s257_s0 = scalar_lea.vmem %s193_s8, 512  ;;  %p262_p1 = scmp.lt.s32.totalorder %s193_s8, %s193_s8 }
   0xc   :  { %230 = vmatprep.subr.bf16.mxu0 %v250_v3  ;;  %p258_p0 = scmp.ne.s32.totalorder %s193_s8, %s257_s0  ;;  %p263_p2 = scmp.lt.s32.totalorder %s257_s0, %s257_s0 }
   0xe   :  { %p264_p3 = por %p263_p2, %p262_p1 }
   0xf   :  { %231 = vmatpush3.bf16.msra.mxu0 %v250_v3 }
  0x10   :  { %232 = vmatprep.subr.bf16.mxu0 %v251_v5  ;;  %p265_p4 = pnand %p264_p3, %p258_p0 }
  0x13   :  { %233 = vmatpush3.bf16.msra.mxu0 %v251_v5 }
  0x14   :  { %234 = vmatprep.subr.bf16.mxu0 %v252_v6 }
  0x17   :  { %235 = vmatpush3.bf16.msra.mxu0 %v252_v6 }
  0x18   :  { %236 = vmatprep.subr.bf16.mxu0 %v253_v7 }
  0x1b   :  { %237 = vmatpush3.bf16.msra.mxu0 %v253_v7 }
  0x1c   :  { %238 = vmatprep.subr.bf16.mxu0 %v254_v8 }
  0x1f   :  { %239 = vmatpush3.bf16.msra.mxu0 %v254_v8 }
  0x22   :  { %241 = vmatmul.mubr.bf16.vlgmr.msra.gmra.mxu0 %v256_v9 }
  0xe2   :  { %v242_v11 = vpop.f32.mrf.mxu0 }
  0xe3   :  { %v181_v12 = vadd.f32 %v242_v11, %v213_v10 }
  0xe4   :  { %v142_v13 = vpop.f32.mrf.mxu0 }
  0xe5   :  { %185 = vst [vmem:[#allocation3 + $0x10] sm:$0xff] %v181_v12  ;;  %v179_v14 = vadd.f32 %v213_v10, %v142_v13 }
  0xe6   :  { %v243_v15 = vpop.f32.mrf.mxu0 }
  0xe7   :  { %183 = vst [vmem:[#allocation3] sm:$0xff] %v179_v14  ;;  %v182_v16 = vadd.f32 %v243_v15, %v213_v10 }
  0xe8   :  { %v145_v17 = vpop.f32.mrf.mxu0 }
  0xe9   :  { %186 = vst [vmem:[#allocation3 + $0x18] sm:$0xff] %v182_v16  ;;  %v180_v18 = vadd.f32 %v213_v10, %v145_v17 }
  0xeb   :  { %184 = vst [vmem:[#allocation3 + $0x8] sm:$0xff] %v180_v18 }
  0xec   :  { %268 = shalt.err (!%p265_p4)
}
  0xed   :  { %s280_s1 = smov 128   ;;  %s281_s2 = smov 8  }
  0xee   :  { %198 = dma.vmem_to_hbm [thread:$0]  %s193_s8, 512, %s341_s3, [#allocation4], %s280_s1, %s280_s1, %s281_s2  }
  0xef   :  { %277 = dma.done.wait [#allocation4], 512  }
  0xf0   :  { %278 = vsyncadd [#allocation4], 4294966784 }
  0xf1   :  { %202 = vsyncpa [#allocation4], 1 }

</bundles_post_ra>
